<compile_context>
chip_gen: v6e
topology: v6e:2x2x1
jax: 0.10.0
libtpu: 0.0.40
codegen_flags: <defaults>
</compile_context>

<pallas_src>
import jax
import jax.numpy as jnp
from jax.experimental import pallas as pl
from jax.experimental.pallas import tpu as pltpu

LANE = 128
SUBLANE = 8
# Above this many vocab rows the one-hot-in-VMEM gather stops making sense
# (B*V compares + B*V*Dp MXU FLOPs per tile, table resident in VMEM).
MAX_VMEM_VOCAB = 8192
# Minimum rows per TensorCore before it is worth splitting a small batch into
# two grid steps (v7x megacore).
MIN_ROWS_PER_CORE = 512


def _round_up(x, m):
    return (x + m - 1) // m * m


def _vmem_limit_bytes():
    """~75% of physical VMEM, capped at 100 MiB; safe on v5e/v6e/v7x."""
    try:
        cap = pltpu.get_tpu_info().vmem_capacity_bytes
    except Exception:  # conservative fallback (fits v7x's 64 MiB per TC)
        cap = 64 * 1024 * 1024
    return min(int(cap * 3 // 4), 100 * 1024 * 1024)


def _gelu_tanh(x):
    # tanh-approximate GELU (guaranteed Mosaic lowering; EUP tanh).
    c = 0.7978845608028654  # sqrt(2/pi)
    return 0.5 * x * (1.0 + jnp.tanh(c * (x + 0.044715 * x * x * x)))


def item_tower_kernel(ids_ref, feat_ref, emb_ref, w1_ref, b1_ref, w2_ref,
                      b2_ref, o_ref):
    """Fused: one-hot embedding gather + Linear/GELU/Linear + add + L2-norm."""
    ids = ids_ref[...]                                        # (Bt, 1) int32
    n_rows, vocab = ids.shape[0], emb_ref.shape[0]

    # Embedding lookup as a one-hot matmul on the MXU (table VMEM-resident,
    # single-buffered).  0/1 one-hot entries are exact in bf16.
    col = jax.lax.broadcasted_iota(jnp.int32, (n_rows, vocab), 1)
    onehot = (col == ids).astype(emb_ref.dtype)               # (Bt, V)
    item_emb = jnp.dot(onehot, emb_ref[...],
                       preferred_element_type=jnp.float32)    # (Bt, Dp) f32

    # Feature MLP: Linear -> GELU -> Linear (dropout = identity at inference).
    # MXU operands may be bf16; biases / accumulation / elementwise stay f32.
    h = jnp.dot(feat_ref[...], w1_ref[...],
                preferred_element_type=jnp.float32) + b1_ref[...]
    h = _gelu_tanh(h)
    feat_emb = jnp.dot(h.astype(w2_ref.dtype), w2_ref[...],
                       preferred_element_type=jnp.float32) + b2_ref[...]

    # Residual add + row-wise L2 normalization: one EUP rsqrt + a VPU mul.
    # Padded lanes are exactly 0, so the norm is unchanged by the padding.
    e = item_emb + feat_emb                                   # (Bt, Dp) f32
    sumsq = jnp.sum(e * e, axis=-1, keepdims=True)
    inv_norm = jax.lax.rsqrt(jnp.maximum(sumsq, 1e-24))       # == 1/max(|e|,1e-12)
    o_ref[...] = (e * inv_norm).astype(o_ref.dtype)


def item_tower_forward(item_id, item_feature, params, *, tile_b=1024,
                       compute_dtype=jnp.bfloat16, return_padded=False):
    """Matches ItemTower.forward: returns the normalized item embedding (B, d)."""
    emb = params["item_emb"]              # (V, D)
    w1, b1 = params["w1"], params["b1"]   # (d2, H), (1, H)
    w2, b2 = params["w2"], params["b2"]   # (H, D), (1, D)

    B = item_id.shape[0]
    d2 = item_feature.shape[1]
    V, D = emb.shape
    H = w1.shape[1]

    if V > MAX_VMEM_VOCAB:
        # TODO(synk): switch to an HBM table (memory_space=pl.ANY) + scalar-
        # prefetched ids + double-buffered pltpu.make_async_copy row gather.
        raise NotImplementedError(
            f"vocab={V} exceeds the VMEM-resident one-hot gather budget "
            f"({MAX_VMEM_VOCAB} rows); use the HBM DMA-gather design.")

    Dp = _round_up(D, LANE)
    Hp = _round_up(H, LANE)

    # Zero-pad lane dims -> lane-dense MXU operands & lane-dense output stores.
    # MXU operands in compute_dtype (bf16); biases stay f32.
    emb_p = jnp.pad(emb, ((0, 0), (0, Dp - D))).astype(compute_dtype)
    w1_p = jnp.pad(w1, ((0, 0), (0, Hp - H))).astype(compute_dtype)
    b1_p = jnp.pad(b1, ((0, 0), (0, Hp - H))).astype(jnp.float32)
    w2_p = jnp.pad(w2, ((0, Hp - H), (0, Dp - D))).astype(compute_dtype)
    b2_p = jnp.pad(b2, ((0, 0), (0, Dp - D))).astype(jnp.float32)

    # Row-tile selection: as large as tile_b allows, >= 2 steps once the batch
    # justifies a megacore split, padding only the last tile (Bp == B whenever
    # B is already a multiple of 8 -> no batch-row slice copy afterwards).
    if B <= tile_b:
        n_tiles = 2 if B >= 2 * MIN_ROWS_PER_CORE else 1
    else:
        n_tiles = pl.cdiv(B, tile_b)
    tb = _round_up(pl.cdiv(B, n_tiles), SUBLANE)
    Bp = n_tiles * tb

    ids_p = jnp.pad(item_id.astype(jnp.int32), (0, Bp - B)).reshape(Bp, 1)
    feat_p = jnp.pad(item_feature, ((0, Bp - B), (0, 0))).astype(compute_dtype)

    def row_spec(shape):
        # Streams with the grid (default double-buffered pipelining).
        return pl.BlockSpec(shape, lambda i: (i, 0))

    def const_spec(shape):
        # Constant index_map: DMA'd once, stays VMEM-resident; single-buffered
        # so the table/weights don't pay the default 2x buffering footprint.
        return pl.BlockSpec(shape, lambda i: (0, 0),
                            pipeline_mode=pl.Buffered(1))

    out = pl.pallas_call(
        item_tower_kernel,
        out_shape=jax.ShapeDtypeStruct((Bp, Dp), jnp.float32),
        grid=(n_tiles,),
        in_specs=[
            row_spec((tb, 1)),        # item ids      (streams with the grid)
            row_spec((tb, d2)),       # item features (streams with the grid)
            const_spec((V, Dp)),      # embedding table (resident, 1-buffered)
            const_spec((d2, Hp)),     # W1
            const_spec((1, Hp)),      # b1
            const_spec((Hp, Dp)),     # W2
            const_spec((1, Dp)),      # b2
        ],
        out_specs=row_spec((tb, Dp)),
        compiler_params=pltpu.CompilerParams(
            dimension_semantics=("parallel",),
            vmem_limit_bytes=_vmem_limit_bytes()),
    )(ids_p, feat_p, emb_p, w1_p, b1_p, w2_p, b2_p)

    if return_padded:
        # Preferred for real pipelines: consume the lane-dense (Bp, Dp) slab
        # directly in the downstream user·item dot (padded lanes are 0) and
        # skip the extra HBM round trip of a slice copy.
        return out
    return out[:B, :D]


def init_params(key, vocab, d_feature, embed_dim, hidden=32):
    k0, k1, k2 = jax.random.split(key, 3)

    def xavier(k, shape):
        fan_in, fan_out = shape
        lim = (6.0 / (fan_in + fan_out)) ** 0.5
        return jax.random.uniform(k, shape, jnp.float32, -lim, lim)

    return {
        "item_emb": jax.random.normal(k0, (vocab, embed_dim), jnp.float32),
        "w1": xavier(k1, (d_feature, hidden)),
        "b1": jnp.zeros((1, hidden), jnp.float32),
        "w2": xavier(k2, (hidden, embed_dim)),
        "b2": jnp.zeros((1, embed_dim), jnp.float32),
    }


def reference_forward(item_id, item_feature, params, *,
                      compute_dtype=jnp.bfloat16):
    """Pure-JAX reference with the same bf16-operand / f32-accumulate math."""
    cd = compute_dtype
    emb = jnp.take(params["item_emb"].astype(cd), item_id,
                   axis=0).astype(jnp.float32)
    h = jnp.dot(item_feature.astype(cd), params["w1"].astype(cd),
                preferred_element_type=jnp.float32) + params["b1"]
    h = _gelu_tanh(h)
    feat_emb = jnp.dot(h.astype(cd), params["w2"].astype(cd),
                       preferred_element_type=jnp.float32) + params["b2"]
    e = emb + feat_emb
    sumsq = jnp.sum(e * e, axis=1, keepdims=True)
    return e * jax.lax.rsqrt(jnp.maximum(sumsq, 1e-24))


if __name__ == "__main__":
    B = 8
    vocab = 64
    d_feature = 16
    embed_dim = 64
    hidden = 32

    key = jax.random.PRNGKey(0)
    k_param, k_id, k_feat = jax.random.split(key, 3)

    params = init_params(k_param, vocab, d_feature, embed_dim, hidden)
    item_id = jax.random.randint(k_id, (B,), 0, vocab, dtype=jnp.int32)
    item_feature = jax.random.normal(k_feat, (B, d_feature), jnp.float32)

    fwd = jax.jit(item_tower_forward)
    out = fwd(item_id, item_feature, params)
    jax.block_until_ready(out)

    ref = reference_forward(item_id, item_feature, params)
    assert out.shape == (B, embed_dim)
    # Both sides use identical bf16 operands; the loose atol only covers
    # bf16 rounding-boundary flips of the GELU activation cast.
    assert jnp.allclose(out, ref, atol=2e-3, rtol=0), float(
        jnp.max(jnp.abs(out - ref)))

    print("KERNEL_OK")
</pallas_src>

<mosaic_0001>
module attributes {stable_mosaic.version = 11 : i64} {
  func.func @item_tower_kernel(%arg0: i32, %arg1: memref<8x1xi32, #tpu.memory_space<vmem>>, %arg2: memref<8x16xbf16, #tpu.memory_space<vmem>>, %arg3: memref<64x128xbf16, #tpu.memory_space<vmem>>, %arg4: memref<16x128xbf16, #tpu.memory_space<vmem>>, %arg5: memref<1x128xf32, #tpu.memory_space<vmem>>, %arg6: memref<128x128xbf16, #tpu.memory_space<vmem>>, %arg7: memref<1x128xf32, #tpu.memory_space<vmem>>, %arg8: memref<8x128xf32, #tpu.memory_space<vmem>>) attributes {dimension_semantics = [#tpu.dimension_semantics<parallel>], iteration_bounds = array<i64: 1>, scalar_prefetch = 0 : i64, scratch_operands = 0 : i64, tpu.core_type = #tpu.core_type<tc>, window_params = [{transform_indices = @transform_0, window_bounds = array<i64: 8, 1>}, {transform_indices = @transform_1, window_bounds = array<i64: 8, 16>}, {pipeline_mode = #tpu.pipeline_mode<synchronous>, transform_indices = @transform_2, window_bounds = array<i64: 64, 128>}, {pipeline_mode = #tpu.pipeline_mode<synchronous>, transform_indices = @transform_3, window_bounds = array<i64: 16, 128>}, {pipeline_mode = #tpu.pipeline_mode<synchronous>, transform_indices = @transform_4, window_bounds = array<i64: 1, 128>}, {pipeline_mode = #tpu.pipeline_mode<synchronous>, transform_indices = @transform_5, window_bounds = array<i64: 128, 128>}, {pipeline_mode = #tpu.pipeline_mode<synchronous>, transform_indices = @transform_6, window_bounds = array<i64: 1, 128>}, {transform_indices = @transform_7, window_bounds = array<i64: 8, 128>}]} {
    %c0 = arith.constant 0 : index
    %c0_0 = arith.constant 0 : index
    %0 = vector.load %arg1[%c0, %c0_0] : memref<8x1xi32, #tpu.memory_space<vmem>>, vector<8x1xi32>
    %1 = tpu.iota {dimensions = array<i32: 1>} : vector<8x64xi32>
    %2 = vector.broadcast %0 : vector<8x1xi32> to vector<8x64xi32>
    %3 = arith.cmpi eq, %1, %2 : vector<8x64xi32>
    %4 = arith.extui %3 : vector<8x64xi1> to vector<8x64xi32>
    %5 = arith.sitofp %4 : vector<8x64xi32> to vector<8x64xf32>
    %6 = arith.truncf %5 : vector<8x64xf32> to vector<8x64xbf16>
    %c0_1 = arith.constant 0 : index
    %c0_2 = arith.constant 0 : index
    %7 = vector.load %arg3[%c0_1, %c0_2] : memref<64x128xbf16, #tpu.memory_space<vmem>>, vector<64x128xbf16>
    %cst = arith.constant dense<0.000000e+00> : vector<8x128xf32>
    %8 = tpu.matmul %6, %7, %cst {dimension_numbers = #tpu.dot_dimension_numbers<[1], [0], [0], [1], [0, 0, 1, 1], [], []>} : vector<8x64xbf16>, vector<64x128xbf16>, vector<8x128xf32> -> vector<8x128xf32>
    %c0_3 = arith.constant 0 : index
    %c0_4 = arith.constant 0 : index
    %9 = vector.load %arg2[%c0_3, %c0_4] : memref<8x16xbf16, #tpu.memory_space<vmem>>, vector<8x16xbf16>
    %c0_5 = arith.constant 0 : index
    %c0_6 = arith.constant 0 : index
    %10 = vector.load %arg4[%c0_5, %c0_6] : memref<16x128xbf16, #tpu.memory_space<vmem>>, vector<16x128xbf16>
    %cst_7 = arith.constant dense<0.000000e+00> : vector<8x128xf32>
    %11 = tpu.matmul %9, %10, %cst_7 {dimension_numbers = #tpu.dot_dimension_numbers<[1], [0], [0], [1], [0, 0, 1, 1], [], []>} : vector<8x16xbf16>, vector<16x128xbf16>, vector<8x128xf32> -> vector<8x128xf32>
    %c0_8 = arith.constant 0 : index
    %c0_9 = arith.constant 0 : index
    %12 = vector.load %arg5[%c0_8, %c0_9] : memref<1x128xf32, #tpu.memory_space<vmem>>, vector<1x128xf32>
    %13 = vector.broadcast %12 : vector<1x128xf32> to vector<8x128xf32>
    %14 = arith.addf %11, %13 : vector<8x128xf32>
    %cst_10 = arith.constant 5.000000e-01 : f32
    %15 = vector.broadcast %cst_10 : f32 to vector<8x128xf32>
    %16 = arith.mulf %15, %14 : vector<8x128xf32>
    %cst_11 = arith.constant 4.471500e-02 : f32
    %17 = vector.broadcast %cst_11 : f32 to vector<8x128xf32>
    %18 = arith.mulf %17, %14 : vector<8x128xf32>
    %19 = arith.mulf %18, %14 : vector<8x128xf32>
    %20 = arith.mulf %19, %14 : vector<8x128xf32>
    %21 = arith.addf %14, %20 : vector<8x128xf32>
    %cst_12 = arith.constant 0.797884583 : f32
    %22 = vector.broadcast %cst_12 : f32 to vector<8x128xf32>
    %23 = arith.mulf %22, %21 : vector<8x128xf32>
    %24 = math.tanh %23 : vector<8x128xf32>
    %cst_13 = arith.constant 1.000000e+00 : f32
    %25 = vector.broadcast %cst_13 : f32 to vector<8x128xf32>
    %26 = arith.addf %25, %24 : vector<8x128xf32>
    %27 = arith.mulf %16, %26 : vector<8x128xf32>
    %28 = arith.truncf %27 : vector<8x128xf32> to vector<8x128xbf16>
    %c0_14 = arith.constant 0 : index
    %c0_15 = arith.constant 0 : index
    %29 = vector.load %arg6[%c0_14, %c0_15] : memref<128x128xbf16, #tpu.memory_space<vmem>>, vector<128x128xbf16>
    %cst_16 = arith.constant dense<0.000000e+00> : vector<8x128xf32>
    %30 = tpu.matmul %28, %29, %cst_16 {dimension_numbers = #tpu.dot_dimension_numbers<[1], [0], [0], [1], [0, 0, 1, 1], [], []>} : vector<8x128xbf16>, vector<128x128xbf16>, vector<8x128xf32> -> vector<8x128xf32>
    %c0_17 = arith.constant 0 : index
    %c0_18 = arith.constant 0 : index
    %31 = vector.load %arg7[%c0_17, %c0_18] : memref<1x128xf32, #tpu.memory_space<vmem>>, vector<1x128xf32>
    %32 = vector.broadcast %31 : vector<1x128xf32> to vector<8x128xf32>
    %33 = arith.addf %30, %32 : vector<8x128xf32>
    %34 = arith.addf %8, %33 : vector<8x128xf32>
    %35 = arith.mulf %34, %34 : vector<8x128xf32>
    %cst_19 = arith.constant dense<0.000000e+00> : vector<8xf32>
    %36 = vector.multi_reduction <add>, %35, %cst_19 [1] : vector<8x128xf32> to vector<8xf32>
    %37 = vector.shape_cast %36 : vector<8xf32> to vector<8x1xf32>
    %cst_20 = arith.constant 1.000000e-24 : f32
    %38 = vector.broadcast %cst_20 : f32 to vector<8x1xf32>
    %39 = arith.maximumf %37, %38 : vector<8x1xf32>
    %40 = math.rsqrt %39 : vector<8x1xf32>
    %41 = vector.broadcast %40 : vector<8x1xf32> to vector<8x128xf32>
    %42 = arith.mulf %34, %41 : vector<8x128xf32>
    %c0_21 = arith.constant 0 : index
    %c0_22 = arith.constant 0 : index
    %43 = vector.load %arg8[%c0_21, %c0_22] : memref<8x128xf32, #tpu.memory_space<vmem>>, vector<8x128xf32>
    tpu.vector_store %arg8[%c0_21, %c0_22], %42 {strides = array<i32>} : memref<8x128xf32, #tpu.memory_space<vmem>>, vector<8x128xf32>,
    return
  }
  func.func @transform_0(%arg0: i32) -> (i32, i32) {
    %c0_i32 = arith.constant 0 : i32
    %c0_i32_0 = arith.constant 0 : i32
    return %arg0, %c0_i32 : i32, i32
  }
  func.func @transform_1(%arg0: i32) -> (i32, i32) {
    %c0_i32 = arith.constant 0 : i32
    %c0_i32_0 = arith.constant 0 : i32
    return %arg0, %c0_i32 : i32, i32
  }
  func.func @transform_2(%arg0: i32) -> (i32, i32) {
    %c0_i32 = arith.constant 0 : i32
    %c0_i32_0 = arith.constant 0 : i32
    %c0_i32_1 = arith.constant 0 : i32
    return %c0_i32, %c0_i32_0 : i32, i32
  }
  func.func @transform_3(%arg0: i32) -> (i32, i32) {
    %c0_i32 = arith.constant 0 : i32
    %c0_i32_0 = arith.constant 0 : i32
    %c0_i32_1 = arith.constant 0 : i32
    return %c0_i32, %c0_i32_0 : i32, i32
  }
  func.func @transform_4(%arg0: i32) -> (i32, i32) {
    %c0_i32 = arith.constant 0 : i32
    %c0_i32_0 = arith.constant 0 : i32
    %c0_i32_1 = arith.constant 0 : i32
    return %c0_i32, %c0_i32_0 : i32, i32
  }
  func.func @transform_5(%arg0: i32) -> (i32, i32) {
    %c0_i32 = arith.constant 0 : i32
    %c0_i32_0 = arith.constant 0 : i32
    %c0_i32_1 = arith.constant 0 : i32
    return %c0_i32, %c0_i32_0 : i32, i32
  }
  func.func @transform_6(%arg0: i32) -> (i32, i32) {
    %c0_i32 = arith.constant 0 : i32
    %c0_i32_0 = arith.constant 0 : i32
    %c0_i32_1 = arith.constant 0 : i32
    return %c0_i32, %c0_i32_0 : i32, i32
  }
  func.func @transform_7(%arg0: i32) -> (i32, i32) {
    %c0_i32 = arith.constant 0 : i32
    %c0_i32_0 = arith.constant 0 : i32
    return %arg0, %c0_i32 : i32, i32
  }
}

</mosaic_0001>

<bundles_post_ra>
// kernel: item_tower_forward.1
= control target key start
LH: loop header
LB: loop body
LE: loop exit
PB: predicated region body
PF: predicated region fallthrough
CT: control target
= control target key end

     0   :  { %v432_v1 = vmov 0.0   ;;  %vm433_vm0 = vmmov 0   ;;  %vm62_vm1 = vcmask 130048   ;;  %v434_v4 = vmov 0   ;;  %s530_s0 = inlined_call_operand.vmem [shape: s32[8,1], index: 0, kind: input, shape index: {}]   ;;  %s531_s1 = inlined_call_operand.vmem [shape: bf16[8,16], index: 1, kind: input, shape index: {}]   ;;  %s532_s2 = inlined_call_operand.vmem [shape: bf16[64,128], index: 2, kind: input, shape index: {}]   ;;  %s533_s3 = inlined_call_operand.vmem [shape: bf16[16,128], index: 3, kind: input, shape index: {}]   ;;  %s534_s4 = inlined_call_operand.vmem [shape: f32[1,128], index: 4, kind: input, shape index: {}]   ;;  %s535_s5 = inlined_call_operand.vmem [shape: bf16[128,128], index: 5, kind: input, shape index: {}]   ;;  %s536_s6 = inlined_call_operand.vmem [shape: f32[1,128], index: 6, kind: input, shape index: {}]   ;;  %s537_s7 = inlined_call_operand.hbm [shape: f32[8,128], index: 7, kind: output, shape index: {}]  }
   0x1   :  { %v393_v0 = vld [vmem:[%s533_s3] sm:$0xff]   ;;  %350 = vmatprep.subr.bf16.mxu0 %v432_v1  ;;  %356 = vmatprep.subr.bf16.mxu1 %v432_v1 }
   0x2   :  { %v46_v2 = vld [vmem:[%s531_s1] sm:$0xf]  ;;  %351 = vmatpush3.bf16.msra.mxu0 %v393_v0  ;;  %352 = vmatprep.mubr.msk.bf16.mxu0 %vm433_vm0, %v432_v1 }
   0x3   :  { %v28_v3 = vld [vmem:[%s530_s0] sm:$0xff]  ;;  %392 = vset.pattern.permute.xlu0 %v434_v4  ;;  %376 = vmatprep.subr.bf16.mxu0 %v432_v1 }
   0x4   :  { %32 = vperm.xlu0 %392, %v28_v3   ;;  %372 = vmatprep.mubr.msk.bf16.mxu1 %vm433_vm0, %v432_v1 }
   0x5   :  { %353 = vmatmul.mubr.msk.bf16.vlgmr.msra.gmra.mxu0 %vm62_vm1, %v46_v2 }
   0x6   :  { %384 = vmatprep.mubr.msk.bf16.mxu0 %vm433_vm0, %v432_v1 }
   0x7   :  { %12 = vsyncpa [#allocation3], 0  ;;  %v394_v5 = vld [vmem:[%s535_s5 + $0x38] sm:$0xff]   ;;  %v395_v6 = vld [vmem:[%s535_s5 + $0x30] sm:$0xff]   ;;  %v29_v17 = vlaneseq  ;;  %vm251_vm3 = vcmask 523264   ;;  %s435_s29 = smov [#allocation2]  }
   0x8   :  { %357 = vmatpush3.bf16.msra.mxu1 %v394_v5  ;;  %v396_v7 = vld [vmem:[%s535_s5 + $0x28] sm:$0xff]   ;;  %v398_v8 = vld [vmem:[%s532_s2 + $0x18] sm:$0xff]   ;;  %v400_v9 = vld [vmem:[%s532_s2 + $0x10] sm:$0xff]   ;;  %s308_s3 = sshll.u32 %s435_s29, 4  ;;  %s309_s3 = int_to_ptr.vmem [resolvable:$true] %s308_s3 }
   0x9   :  { %358 = vmatprep.subr.bf16.mxu1 %v432_v1  ;;  %377 = vmatpush3.bf16.msra.mxu0 %v398_v8  ;;  %v397_v10 = vld [vmem:[%s535_s5 + $0x20] sm:$0xff]   ;;  %v402_v11 = vld [vmem:[%s532_s2 + $0x8] sm:$0xff]   ;;  %v399_v12 = vld [vmem:[%s535_s5 + $0x18] sm:$0xff]   ;;  %v30_v18 = vand.u32 127, %v29_v17  ;;  %s410_s30 = scalar_lea.vmem %s309_s3, 128  ;;  %p415_p1 = scmp.lt.s32.totalorder %s309_s3, %s309_s3 }
   0xa   :  { %378 = vmatprep.subr.bf16.mxu0 %v432_v1  ;;  %v404_v13 = vld [vmem:[%s532_s2] sm:$0xff]   ;;  %v401_v14 = vld [vmem:[%s535_s5 + $0x10] sm:$0xff]   ;;  %v403_v15 = vld [vmem:[%s535_s5 + $0x8] sm:$0xff]   ;;  %p411_p0 = scmp.ne.s32.totalorder %s309_s3, %s410_s30  ;;  %p416_p2 = scmp.lt.s32.totalorder %s410_s30, %s410_s30 }
   0xb   :  { %v405_v16 = vld [vmem:[%s535_s5] sm:$0xff]  }
   0xc   :  { %359 = vmatpush3.bf16.msra.mxu1 %v395_v6  ;;  %v317_v22 = vld [vmem:[%s534_s4] ss:$0 sm:$0xff]  ;;  %p417_p3 = por %p416_p2, %p415_p1 }
   0xd   :  { %360 = vmatprep.subr.bf16.mxu1 %v432_v1  ;;  %379 = vmatpush3.bf16.msra.mxu0 %v400_v9  ;;  %v320_v42 = vld [vmem:[%s536_s6] ss:$0 sm:$0xff] }
   0xe   :  { %380 = vmatprep.subr.bf16.mxu0 %v432_v1  ;;  %p418_p4 = pnand %p417_p3, %p411_p0 }
  0x10   :  { %361 = vmatpush3.bf16.msra.mxu1 %v396_v7 }
  0x11   :  { %362 = vmatprep.subr.bf16.mxu1 %v432_v1  ;;  %381 = vmatpush3.bf16.msra.mxu0 %v402_v11 }
  0x12   :  { %382 = vmatprep.subr.bf16.mxu0 %v432_v1 }
  0x14   :  { %363 = vmatpush3.bf16.msra.mxu1 %v397_v10 }
  0x15   :  { %364 = vmatprep.subr.bf16.mxu1 %v432_v1  ;;  %383 = vmatpush3.bf16.msra.mxu0 %v404_v13 }
  0x18   :  { %365 = vmatpush3.bf16.msra.mxu1 %v399_v12 }
  0x19   :  { %366 = vmatprep.subr.bf16.mxu1 %v432_v1 }
  0x1c   :  { %367 = vmatpush3.bf16.msra.mxu1 %v401_v14 }
  0x1d   :  { %368 = vmatprep.subr.bf16.mxu1 %v432_v1 }
  0x20   :  { %369 = vmatpush3.bf16.msra.mxu1 %v403_v15 }
  0x21   :  { %370 = vmatprep.subr.bf16.mxu1 %v432_v1 }
  0x24   :  { %371 = vmatpush3.bf16.msra.mxu1 %v405_v16 }
  0x7f   :  { %v33_v19 = vpop.permute.xlu0 %32 }
  0x80   :  { %vm34_vm2 = vcmp.eq.s32.totalorder %v30_v18, %v33_v19 }
  0x81   :  { %v316_v20 = vsel %vm34_vm2, 1.0, %v432_v1 }
  0x82   :  { %v37_v21 = vpack.c.bf16 %v316_v20, %v316_v20 }
  0x84   :  { %385 = vmatmul.mubr.msk.bf16.vlgmr.msra.gmra.mxu0 %vm251_vm3, %v37_v21 }
  0xc5   :  { %v100_v23 = vpop.f32.mrf.mxu0 }
  0xc6   :  { %v101_v24 = vadd.f32 %v317_v22, %v100_v23 }
  0xc7   :  { %v354_v25 = vpop.f32.mrf.mxu0 }
  0xc8   :  { %v107_v26 = vmul.f32 0.044715, %v101_v24  ;;  %v106_v34 = vmul.f32 0.5, %v101_v24 }
  0xc9   :  { %v103_v27 = vpop.f32.mrf.mxu0 }
  0xca   :  { %v108_v28 = vmul.f32 %v107_v26, %v101_v24 }
  0xcb   :  { %v355_v29 = vpop.f32.mrf.mxu0 }
  0xcc   :  { %v109_v30 = vmul.f32 %v108_v28, %v101_v24 }
  0xce   :  { %v110_v31 = vadd.f32 %v109_v30, %v101_v24 }
  0xd0   :  { %v111_v32 = vmul.f32 0.7978846, %v110_v31 }
  0xd2   :  { %406 = vtanh.f32 %v111_v32 }
  0xdf   :  { %v407_v33 = vpop.eup %406 }
  0xe0   :  { %v113_v35 = vadd.f32 1.0, %v407_v33 }
  0xe2   :  { %v114_v36 = vmul.f32 %v113_v35, %v106_v34 }
  0xe4   :  { %v115_v37 = vpack.c.bf16 %v114_v36, %v114_v36 }
  0xe6   :  { %373 = vmatmul.mubr.bf16.vlgmr.msra.gmra.mxu1 %v115_v37 }
 0x144   :  { %v289_v38 = vpop.f32.mrf.mxu0 }
 0x146   :  { %v386_v39 = vpop.f32.mrf.mxu0 }
 0x148   :  { %v292_v40 = vpop.f32.mrf.mxu0 }
 0x14a   :  { %v387_v41 = vpop.f32.mrf.mxu0 }
 0x1a6   :  { %v221_v43 = vpop.f32.mrf.mxu1 }
 0x1a7   :  { %v222_v44 = vadd.f32 %v320_v42, %v221_v43 }
 0x1a8   :  { %v374_v45 = vpop.f32.mrf.mxu1 }
 0x1a9   :  { %v290_v46 = vadd.f32 %v289_v38, %v222_v44 }
 0x1aa   :  { %v224_v47 = vpop.f32.mrf.mxu1 }
 0x1ab   :  { %v295_v48 = vmul.f32 %v290_v46, %v290_v46 }
 0x1ac   :  { %v375_v49 = vpop.f32.mrf.mxu1 }
 0x1ad   :  { %296 = vadd.xlane.f32.xlu0 %v295_v48 }
 0x236   :  { %v297_v50 = vpop.xlane.xlu0 %296 }
 0x237   :  { %v298_v51 = vmax.f32 %v297_v50, 1e-24 }
 0x239   :  { %408 = vrsqrt.f32 %v298_v51 }
 0x246   :  { %v409_v52 = vpop.eup %408 }
 0x247   :  { %v300_v53 = vmul.f32 %v409_v52, %v290_v46 }
 0x249   :  { %301 = vst [vmem:[#allocation2] sm:$0xff] %v300_v53 }
 0x24a   :  { %421 = shalt.err (!%p418_p4)
}
 0x24b   :  { %311 = dma.vmem_to_hbm [thread:$0]  %s309_s3, 128, %s537_s7, [#allocation3]  }
 0x24c   :  { %430 = dma.done.wait [#allocation3], 128  }
 0x24d   :  { %431 = vsyncadd [#allocation3], 4294967168 }
 0x24e   :  { %315 = vsyncpa [#allocation3], 1 }

</bundles_post_ra>
